<compile_context>
chip_gen: v6e
topology: v6e:2x2x1
jax: 0.10.0
libtpu: 0.0.40
codegen_flags: <defaults>
</compile_context>

<pallas_src>
import jax
import jax.numpy as jnp
from jax.experimental import pallas as pl
from jax.experimental.pallas import tpu as pltpu

_LANE = 128
_TARGET_BLOCK_ELEMS = 512 * 1024   # ~2 MiB per f32 stream per pipeline buffer
_PALLAS_MIN_ELEMS = 1 << 17        # ~512 KiB/stream f32 break-even for a custom call


def _direct_return_kernel(a_ref, b_ref, c_ref, ab_ref, ac_ref):
    # Elementwise hot path: load `a` once, reuse for both VPU adds.
    a = a_ref[...]
    ab_ref[...] = a + b_ref[...]
    ac_ref[...] = a + c_ref[...]


def _sublane_multiple(dtype):
    # 8 rows for 32-bit, 16 for bf16/fp16, 32 for int8/fp8 (sublane packing).
    return max(8, 32 // jnp.dtype(dtype).itemsize)


def _choose_cols(n):
    # Largest lane-dense column count (multiple of 128) that divides n,
    # enabling a zero-copy reshape of the flattened inputs.
    for cols in (1024, 512, 256, 128):
        if n % cols == 0:
            return cols
    return None


def _pallas_add_pair_2d(a2, b2, c2):
    """Lane-dense (rows, cols) inputs with cols % 128 == 0. Returns (a+b, a+c)."""
    rows, cols = a2.shape
    dtype = a2.dtype
    itemsize = jnp.dtype(dtype).itemsize
    sub = _sublane_multiple(dtype)

    block_rows = max(sub, (_TARGET_BLOCK_ELEMS // cols) // sub * sub)
    if block_rows >= rows:
        block_rows = rows  # single full-array block: exempt from (8,128) rule
    grid = (pl.cdiv(rows, block_rows),)

    blk = pl.BlockSpec((block_rows, cols), lambda i: (i, 0))
    block_bytes = block_rows * cols * itemsize
    # 5 streams (3 in + 2 out) x 2 pipeline buffers, plus headroom.
    vmem_limit = int(min(5 * 2 * block_bytes + (8 << 20), 48 << 20))

    return pl.pallas_call(
        _direct_return_kernel,
        out_shape=(
            jax.ShapeDtypeStruct((rows, cols), dtype),
            jax.ShapeDtypeStruct((rows, cols), dtype),
        ),
        grid=grid,
        in_specs=[blk, blk, blk],
        out_specs=(blk, blk),
        compiler_params=pltpu.CompilerParams(
            # "parallel" shards the 1-D grid across both TensorCores on v7x.
            dimension_semantics=("parallel",),
            vmem_limit_bytes=vmem_limit,
        ),
        cost_estimate=pl.CostEstimate(
            flops=2 * rows * cols,
            transcendentals=0,
            bytes_accessed=5 * itemsize * rows * cols,
        ),
    )(a2, b2, c2)


def direct_return_forward(a, b, c, *, min_pallas_elems=_PALLAS_MIN_ELEMS):
    """Reproduces DirectReturnModule.forward: returns (a + b, a + c, b)."""
    assert a.shape == b.shape == c.shape
    assert a.dtype == b.dtype == c.dtype
    n = a.size

    if n < min_pallas_elems:
        # Small/medium inputs: launch + 5-stream DMA setup + lost XLA fusion
        # dwarf the 2 adds/elem, so stay in fused jnp ops.
        return a + b, a + c, b

    cols = _choose_cols(n)
    if cols is not None:
        # Zero-copy path: flat reshape of a contiguous array is free; no pad,
        # no output slicing -> exactly 5 HBM stream traversals.
        ab2, ac2 = _pallas_add_pair_2d(
            a.reshape(-1, cols), b.reshape(-1, cols), c.reshape(-1, cols)
        )
        return ab2.reshape(a.shape), ac2.reshape(a.shape), b

    # Ragged size: Pallas on the 128-aligned bulk, tiny tail in plain jnp.
    bulk = (n // _LANE) * _LANE
    if bulk == 0:
        return a + b, a + c, b
    af, bf, cf = a.reshape(-1), b.reshape(-1), c.reshape(-1)
    ab_bulk, ac_bulk = _pallas_add_pair_2d(
        af[:bulk].reshape(-1, _LANE),
        bf[:bulk].reshape(-1, _LANE),
        cf[:bulk].reshape(-1, _LANE),
    )
    ab = jnp.concatenate([ab_bulk.reshape(-1), af[bulk:] + bf[bulk:]])
    ac = jnp.concatenate([ac_bulk.reshape(-1), af[bulk:] + cf[bulk:]])
    return ab.reshape(a.shape), ac.reshape(a.shape), b


if __name__ == "__main__":
    keys = jax.random.split(jax.random.PRNGKey(0), 12)

    def check(shape, ks, force=False):
        a = jax.random.uniform(ks[0], shape, dtype=jnp.float32)
        b = jax.random.uniform(ks[1], shape, dtype=jnp.float32)
        c = jax.random.uniform(ks[2], shape, dtype=jnp.float32)
        kwargs = {"min_pallas_elems": 0} if force else {}
        ab, ac, b_out = direct_return_forward(a, b, c, **kwargs)
        jax.block_until_ready((ab, ac, b_out))
        assert ab.shape == a.shape and ac.shape == a.shape
        assert jnp.allclose(ab, a + b), f"a + b mismatch for {shape}"
        assert jnp.allclose(ac, a + c), f"a + c mismatch for {shape}"
        assert jnp.array_equal(b_out, b), f"b passthrough mismatch for {shape}"

    # 1) The module's own example shape: (2,) float32 -> small fused-jnp path.
    check((2,), keys[0:3])
    # 2) Small lane-aligned shape forced through the zero-copy Pallas path
    #    (2048 elems, divisible by 1024 -> (2, 1024) single full-array block).
    check((2, 4, 16, 16), keys[3:6], force=True)
    # 3) Ragged size forced through the bulk(Pallas)+tail(jnp) path (1000 elems).
    check((8, 125), keys[6:9], force=True)
    # 4) Large input hitting the default Pallas path with a multi-step grid
    #    (1M elems -> (1024, 1024), block (512, 1024), grid=(2,)).
    check((1024, 1024), keys[9:12])

    print("KERNEL_OK")
</pallas_src>

<mosaic_0001>
module attributes {stable_mosaic.version = 11 : i64} {
  func.func @_direct_return_kernel(%arg0: i32, %arg1: memref<2x1024xf32, #tpu.memory_space<vmem>>, %arg2: memref<2x1024xf32, #tpu.memory_space<vmem>>, %arg3: memref<2x1024xf32, #tpu.memory_space<vmem>>, %arg4: memref<2x1024xf32, #tpu.memory_space<vmem>>, %arg5: memref<2x1024xf32, #tpu.memory_space<vmem>>) attributes {dimension_semantics = [#tpu.dimension_semantics<parallel>], iteration_bounds = array<i64: 1>, scalar_prefetch = 0 : i64, scratch_operands = 0 : i64, tpu.core_type = #tpu.core_type<tc>, window_params = [{transform_indices = @transform_0, window_bounds = array<i64: 2, 1024>}, {transform_indices = @transform_1, window_bounds = array<i64: 2, 1024>}, {transform_indices = @transform_2, window_bounds = array<i64: 2, 1024>}, {transform_indices = @transform_3, window_bounds = array<i64: 2, 1024>}, {transform_indices = @transform_4, window_bounds = array<i64: 2, 1024>}]} {
    %c0 = arith.constant 0 : index
    %c0_0 = arith.constant 0 : index
    %0 = vector.load %arg1[%c0, %c0_0] : memref<2x1024xf32, #tpu.memory_space<vmem>>, vector<2x1024xf32>
    %c0_1 = arith.constant 0 : index
    %c0_2 = arith.constant 0 : index
    %1 = vector.load %arg2[%c0_1, %c0_2] : memref<2x1024xf32, #tpu.memory_space<vmem>>, vector<2x1024xf32>
    %2 = arith.addf %0, %1 : vector<2x1024xf32>
    %c0_3 = arith.constant 0 : index
    %c0_4 = arith.constant 0 : index
    %3 = vector.load %arg4[%c0_3, %c0_4] : memref<2x1024xf32, #tpu.memory_space<vmem>>, vector<2x1024xf32>
    tpu.vector_store %arg4[%c0_3, %c0_4], %2 {strides = array<i32>} : memref<2x1024xf32, #tpu.memory_space<vmem>>, vector<2x1024xf32>,
    %c0_5 = arith.constant 0 : index
    %c0_6 = arith.constant 0 : index
    %4 = vector.load %arg3[%c0_5, %c0_6] : memref<2x1024xf32, #tpu.memory_space<vmem>>, vector<2x1024xf32>
    %5 = arith.addf %0, %4 : vector<2x1024xf32>
    %c0_7 = arith.constant 0 : index
    %c0_8 = arith.constant 0 : index
    %6 = vector.load %arg5[%c0_7, %c0_8] : memref<2x1024xf32, #tpu.memory_space<vmem>>, vector<2x1024xf32>
    tpu.vector_store %arg5[%c0_7, %c0_8], %5 {strides = array<i32>} : memref<2x1024xf32, #tpu.memory_space<vmem>>, vector<2x1024xf32>,
    return
  }
  func.func @transform_0(%arg0: i32) -> (i32, i32) {
    %c0_i32 = arith.constant 0 : i32
    %c0_i32_0 = arith.constant 0 : i32
    return %arg0, %c0_i32 : i32, i32
  }
  func.func @transform_1(%arg0: i32) -> (i32, i32) {
    %c0_i32 = arith.constant 0 : i32
    %c0_i32_0 = arith.constant 0 : i32
    return %arg0, %c0_i32 : i32, i32
  }
  func.func @transform_2(%arg0: i32) -> (i32, i32) {
    %c0_i32 = arith.constant 0 : i32
    %c0_i32_0 = arith.constant 0 : i32
    return %arg0, %c0_i32 : i32, i32
  }
  func.func @transform_3(%arg0: i32) -> (i32, i32) {
    %c0_i32 = arith.constant 0 : i32
    %c0_i32_0 = arith.constant 0 : i32
    return %arg0, %c0_i32 : i32, i32
  }
  func.func @transform_4(%arg0: i32) -> (i32, i32) {
    %c0_i32 = arith.constant 0 : i32
    %c0_i32_0 = arith.constant 0 : i32
    return %arg0, %c0_i32 : i32, i32
  }
}

</mosaic_0001>

<bundles_post_ra>
// kernel: tpu_custom_call.1
= control target key start
LH: loop header
LB: loop body
LE: loop exit
PB: predicated region body
PF: predicated region fallthrough
CT: control target
= control target key end

     0   :  { %10 = vsyncpa [#allocation3], 0  ;;  %s255_s0 = inlined_call_operand.hbm [shape: f32[2,1024], index: 0, kind: input, shape index: {}]   ;;  %s256_s1 = inlined_call_operand.hbm [shape: f32[2,1024], index: 1, kind: input, shape index: {}]   ;;  %s257_s2 = inlined_call_operand.hbm [shape: f32[2,1024], index: 2, kind: input, shape index: {}]   ;;  %s258_s3 = inlined_call_operand.hbm [shape: f32[2,1024], index: 3, kind: output, shape index: {0}]   ;;  %s259_s4 = inlined_call_operand.hbm [shape: f32[2,1024], index: 4, kind: output, shape index: {1}]  }
   0x1   :  { %11 = vsyncpa [#allocation6], 0 }
   0x2   :  { %12 = vsyncpa [#allocation4], 0 }
   0x3   :  { %13 = vsyncpa [#allocation10], 0  ;;  %s210_s15 = smov [#allocation5]   ;;  %s211_s17 = smov [#allocation2]  }
   0x4   :  { %s30_s16 = sshll.u32 %s210_s15, 4  ;;  %s20_s18 = sshll.u32 %s211_s17, 4  ;;  %s31_s16 = int_to_ptr.vmem [resolvable:$true] %s30_s16  ;;  %s21_s18 = int_to_ptr.vmem [resolvable:$true] %s20_s18 }
   0x5   :  { %s110_s19 = scalar_lea.vmem %s31_s16, 256  ;;  %p115_p1 = scmp.lt.s32.totalorder %s31_s16, %s31_s16 }
   0x6   :  { %p111_p0 = scmp.ne.s32.totalorder %s31_s16, %s110_s19  ;;  %p116_p2 = scmp.lt.s32.totalorder %s110_s19, %s110_s19 }
   0x8   :  { %p117_p3 = por %p116_p2, %p115_p1 }
   0xa   :  { %p118_p4 = pnand %p117_p3, %p111_p0 }
   0xc   :  { %121 = shalt.err (!%p118_p4)
}
   0xd   :  { %33 = dma.hbm_to_vmem [thread:$0]  %s256_s1, 256, %s31_s16, [#allocation6]  }
   0xe   :  { %s130_s22 = scalar_lea.vmem %s21_s18, 256  ;;  %p135_p6 = scmp.lt.s32.totalorder %s21_s18, %s21_s18 }
   0xf   :  { %p131_p5 = scmp.ne.s32.totalorder %s21_s18, %s130_s22  ;;  %p136_p7 = scmp.lt.s32.totalorder %s130_s22, %s130_s22 }
  0x11   :  { %p137_p8 = por %p136_p7, %p135_p6 }
  0x13   :  { %p138_p9 = pnand %p137_p8, %p131_p5 }
  0x15   :  { %141 = shalt.err (!%p138_p9)
}
  0x16   :  { %23 = dma.hbm_to_vmem [thread:$0]  %s255_s0, 256, %s21_s18, [#allocation3]  }
  0x17   :  { %s212_s25 = smov [#allocation7]  }
  0x18   :  { %s40_s26 = sshll.u32 %s212_s25, 4  ;;  %s41_s26 = int_to_ptr.vmem [resolvable:$true] %s40_s26 }
  0x19   :  { %s150_s27 = scalar_lea.vmem %s41_s26, 256  ;;  %p155_p11 = scmp.lt.s32.totalorder %s41_s26, %s41_s26 }
  0x1a   :  { %p151_p10 = scmp.ne.s32.totalorder %s41_s26, %s150_s27  ;;  %p156_p12 = scmp.lt.s32.totalorder %s150_s27, %s150_s27 }
  0x1c   :  { %p157_p13 = por %p156_p12, %p155_p11 }
  0x1e   :  { %p158_p0 = pnand %p157_p13, %p151_p10 }
  0x20   :  { %161 = shalt.err (!%p158_p0)
}
  0x21   :  { %43 = dma.hbm_to_vmem [thread:$0]  %s257_s2, 256, %s41_s26, [#allocation6]  }
  0x22   :  { %202 = dma.done.wait [#allocation3], 256  }
  0x23   :  { %203 = vsyncadd [#allocation3], 4294967040 }
  0x24   :  { %204 = dma.done.wait [#allocation6], 512  }
  0x25   :  { %205 = vsyncadd [#allocation6], 4294966784  ;;  %s213_s29 = smov [#allocation8]   ;;  %v53_v0 = vld [vmem:[#allocation2] sm:$0xff]  ;;  %v55_v1 = vld [vmem:[#allocation5] sm:$0xff]  ;;  %s214_s30 = smov [#allocation9]  }
  0x26   :  { %s73_s0 = sshll.u32 %s213_s29, 4  ;;  %v54_v2 = vld [vmem:[#allocation2 + $0x8] sm:$0xff]  ;;  %s83_s5 = sshll.u32 %s214_s30, 4  ;;  %v57_v3 = vadd.f32 %v55_v1, %v53_v0  ;;  %v56_v4 = vld [vmem:[#allocation5 + $0x8] sm:$0xff]  ;;  %v61_v5 = vld [vmem:[#allocation7] sm:$0xff]  ;;  %s74_s0 = int_to_ptr.vmem [resolvable:$true] %s73_s0  ;;  %s84_s5 = int_to_ptr.vmem [resolvable:$true] %s83_s5 }
  0x27   :  { %v62_v6 = vld [vmem:[#allocation7 + $0x8] sm:$0xff]  ;;  %v58_v7 = vadd.f32 %v56_v4, %v54_v2  ;;  %v63_v8 = vadd.f32 %v61_v5, %v53_v0  ;;  %s162_s2 = scalar_lea.vmem %s74_s0, 256  ;;  %p167_p2 = scmp.lt.s32.totalorder %s74_s0, %s74_s0 }
  0x28   :  { %v64_v9 = vadd.f32 %v62_v6, %v54_v2  ;;  %59 = vst [vmem:[#allocation8] sm:$0xff] %v57_v3  ;;  %p163_p1 = scmp.ne.s32.totalorder %s74_s0, %s162_s2  ;;  %p168_p3 = scmp.lt.s32.totalorder %s162_s2, %s162_s2 }
  0x29   :  { %60 = vst [vmem:[#allocation8 + $0x8] sm:$0xff] %v58_v7  ;;  %65 = vst [vmem:[#allocation9] sm:$0xff] %v63_v8 }
  0x2a   :  { %66 = vst [vmem:[#allocation9 + $0x8] sm:$0xff] %v64_v9  ;;  %p169_p4 = por %p168_p3, %p167_p2 }
  0x2c   :  { %p170_p5 = pnand %p169_p4, %p163_p1 }
  0x2e   :  { %173 = shalt.err (!%p170_p5)
}
  0x2f   :  { %76 = dma.vmem_to_hbm [thread:$0]  %s74_s0, 256, %s258_s3, [#allocation4]  }
  0x30   :  { %s182_s8 = scalar_lea.vmem %s84_s5, 256  ;;  %p187_p7 = scmp.lt.s32.totalorder %s84_s5, %s84_s5 }
  0x31   :  { %p183_p6 = scmp.ne.s32.totalorder %s84_s5, %s182_s8  ;;  %p188_p8 = scmp.lt.s32.totalorder %s182_s8, %s182_s8 }
  0x33   :  { %p189_p9 = por %p188_p8, %p187_p7 }
  0x35   :  { %p190_p10 = pnand %p189_p9, %p183_p6 }
  0x37   :  { %193 = shalt.err (!%p190_p10)
}
  0x38   :  { %86 = dma.vmem_to_hbm [thread:$0]  %s84_s5, 256, %s259_s4, [#allocation10]  }
  0x39   :  { %206 = dma.done.wait [#allocation4], 256  }
  0x3a   :  { %207 = vsyncadd [#allocation4], 4294967040 }
  0x3b   :  { %208 = dma.done.wait [#allocation10], 256  }
  0x3c   :  { %209 = vsyncadd [#allocation10], 4294967040 }
  0x3d   :  { %93 = vsyncpa [#allocation3], 1 }
  0x3e   :  { %94 = vsyncpa [#allocation6], 1 }
  0x3f   :  { %95 = vsyncpa [#allocation4], 1 }
  0x40   :  { %96 = vsyncpa [#allocation10], 1 }

</bundles_post_ra>
